<compile_context>
chip_gen: v7x
topology: tpu7x:2x2x1
jax: 0.10.0
libtpu: 0.0.40
codegen_flags: <defaults>
</compile_context>

<pallas_src>
import numpy as np
import jax
import jax.numpy as jnp
from jax.experimental import pallas as pl
from jax.experimental.pallas import tpu as pltpu


def _round_up(x, m):
    return ((x + m - 1) // m) * m


def _upsample1d_kernel(x_ref, hp_ref, hn_ref, wm_ref, wp_ref, wn_ref, b_ref, o_ref):
    # x_ref : (1, TL, C)    input rows [l*TL, (l+1)*TL)
    # hp_ref: (1, SUB, C)   block whose LAST row is x[l*TL - 1]   (valid iff l > 0)
    # hn_ref: (1, SUB, C)   block whose FIRST row is x[(l+1)*TL]  (valid iff l < NT-1)
    # wm_ref: (C, 2C)       [w1 | w2]  applied to x[m]
    # wp_ref: (C, C)        w3         applied to x[m-1] (even outputs)
    # wn_ref: (C, C)        w0         applied to x[m+1] (odd outputs)
    # b_ref : (1, C)        f32 bias
    # o_ref : (1, TL, 2C)   [:, :C] -> even outputs (2m), [:, C:] -> odd (2m+1)
    l = pl.program_id(1)
    nt = pl.num_programs(1)
    tl, c = x_ref.shape[1], x_ref.shape[2]
    sub = hp_ref.shape[1]

    x_cur = x_ref[0]                                      # (TL, C)

    # Halo rows; forced to zero at the global edges (padding=1 semantics).
    prev_row = hp_ref[0, sub - 1:sub, :]                  # (1, C)
    next_row = hn_ref[0, 0:1, :]                          # (1, C)
    prev_row = jnp.where(l > 0, prev_row, jnp.zeros_like(prev_row))
    next_row = jnp.where(l < nt - 1, next_row, jnp.zeros_like(next_row))

    # Shift-by-one-row on the XLU (roll) + single-row splice on the VPU.
    ri = jax.lax.broadcasted_iota(jnp.int32, (tl, c), 0)
    x_prev = jnp.where(ri == 0, prev_row, pltpu.roll(x_cur, 1, 0))            # x[m-1]
    x_next = jnp.where(ri == tl - 1, next_row, pltpu.roll(x_cur, tl - 1, 0))  # x[m+1]

    acc = jnp.dot(x_cur, wm_ref[...], preferred_element_type=jnp.float32)     # (TL, 2C)
    bias = b_ref[...]                                                         # (1, C) f32
    even = acc[:, :c] + jnp.dot(x_prev, wp_ref[...],
                                preferred_element_type=jnp.float32) + bias
    odd = acc[:, c:] + jnp.dot(x_next, wn_ref[...],
                               preferred_element_type=jnp.float32) + bias
    o_ref[0, :, :c] = even.astype(o_ref.dtype)
    o_ref[0, :, c:] = odd.astype(o_ref.dtype)


def upsample1d_nlc(x_blc, weight, bias, *, compute_dtype=jnp.bfloat16, tile_l=1024):
    """ConvTranspose1d(C, C, 4, 2, 1) forward, channels-last.

    x_blc  : (B, L, C)  channels-last activations
    weight : (C, C, 4)  PyTorch ConvTranspose1d layout (in_ch, out_ch, K)
    bias   : (C,)
    returns: (B, 2L, C) in x_blc.dtype (MXU accumulation is f32)
    """
    B, L, C = x_blc.shape
    out_dtype = x_blc.dtype
    cs = jnp.dtype(compute_dtype).itemsize
    osz = jnp.dtype(out_dtype).itemsize

    # Sublane packing of the compute dtype: 8 (f32) / 16 (bf16) / 32 (int8/fp8).
    SUB = max(8, 32 // cs)

    # Generation-aware VMEM budget (v7x: 64 MiB/core; v5e/v6e: 128 MiB).
    try:
        vmem_cap = int(getattr(pltpu.get_tpu_info(), "vmem_capacity_bytes", 64 << 20))
    except Exception:
        vmem_cap = 64 << 20
    cap = (vmem_cap * 3) // 4

    # Footprint model: double-buffered in/out tiles + in-kernel temporaries.
    # (Weights are small now that the zero half-blocks are gone, so default
    # double-buffering of the constant blocks is acceptable even on v7x.)
    per_row = 2 * (C * cs + 2 * C * osz) + 2 * C * cs + 3 * 2 * C * 4
    fixed = 2 * (4 * C * C * cs + 2 * SUB * C * cs + C * 4)
    budget = max(cap - fixed - (8 << 20), 4 * SUB * per_row)

    Lp0 = _round_up(L, SUB)
    TL = min(_round_up(min(tile_l, Lp0), SUB),
             max(SUB, (budget // per_row) // SUB * SUB))
    TL = max(TL, SUB)
    Lp = _round_up(Lp0, TL)          # pad L up to a multiple of TL (tail discarded)
    NT = Lp // TL
    # Expose >= 2 parallel grid steps so v7x's two TensorCores both get work.
    if B * NT < 2 and TL >= 2 * SUB:
        TL = _round_up(TL // 2, SUB)
        Lp = _round_up(Lp0, TL)
        NT = Lp // TL
    nb = TL // SUB
    n_sub = Lp // SUB

    x = x_blc.astype(compute_dtype)
    if Lp != L:
        # Zero rows reproduce the ConvTranspose1d edge behaviour for the last
        # real row; rows beyond L in the output are sliced off below.
        x = jnp.pad(x, ((0, 0), (0, Lp - L), (0, 0)))

    # Fold taps: even = x[m]@w1 + x[m-1]@w3 + b ; odd = x[m]@w2 + x[m+1]@w0 + b
    w0, w1, w2, w3 = (weight[:, :, k] for k in range(4))
    wm = jnp.concatenate([w1, w2], axis=1).astype(compute_dtype)   # (C, 2C)
    wp = w3.astype(compute_dtype)                                  # (C, C)
    wn = w0.astype(compute_dtype)                                  # (C, C)
    b2 = bias.astype(jnp.float32)[None, :]                         # (1, C)

    vmem_limit = int(min(max(fixed + TL * per_row + (8 << 20), 16 << 20), cap))

    cost = pl.CostEstimate(
        flops=int(2 * B * Lp * 4 * C * C),
        transcendentals=0,
        bytes_accessed=int(B * Lp * C * cs + 2 * B * NT * SUB * C * cs
                           + 4 * C * C * cs + C * 4 + B * Lp * 2 * C * osz),
    )

    out = pl.pallas_call(
        _upsample1d_kernel,
        out_shape=jax.ShapeDtypeStruct((B, Lp, 2 * C), out_dtype),
        grid=(B, NT),
        in_specs=[
            # current L tile
            pl.BlockSpec((1, TL, C), lambda bi, li: (bi, li, 0)),
            # SUB-row block ending at row li*TL - 1 (clamped; masked at li == 0)
            pl.BlockSpec((1, SUB, C),
                         lambda bi, li: (bi, jnp.maximum(li * nb - 1, 0), 0)),
            # SUB-row block starting at row (li+1)*TL (clamped; masked at last tile)
            pl.BlockSpec((1, SUB, C),
                         lambda bi, li: (bi, jnp.minimum((li + 1) * nb, n_sub - 1), 0)),
            # weights + bias (constant block index -> resident)
            pl.BlockSpec((C, 2 * C), lambda bi, li: (0, 0)),
            pl.BlockSpec((C, C), lambda bi, li: (0, 0)),
            pl.BlockSpec((C, C), lambda bi, li: (0, 0)),
            pl.BlockSpec((1, C), lambda bi, li: (0, 0)),
        ],
        out_specs=pl.BlockSpec((1, TL, 2 * C), lambda bi, li: (bi, li, 0)),
        compiler_params=pltpu.CompilerParams(
            dimension_semantics=("parallel", "parallel"),
            vmem_limit_bytes=vmem_limit,
        ),
        cost_estimate=cost,
    )(x, x, x, wm, wp, wn, b2)

    # (B, L, 2C) row-major == (B, 2L, C) with even/odd interleaved (free reshape).
    return out[:, :L, :].reshape(B, 2 * L, C)


def upsample1d(x_ncl, weight, bias, *, compute_dtype=jnp.bfloat16, tile_l=1024):
    """PyTorch-layout wrapper: (B, C, L) -> (B, C, 2L) (ConvTranspose1d(C,C,4,2,1)).

    # TODO(synk): the NCL<->NLC transposes below are extra HBM round-trips; call
    # upsample1d_nlc directly if the surrounding model can stay channels-last.
    """
    x_blc = jnp.transpose(x_ncl, (0, 2, 1))
    out = upsample1d_nlc(x_blc, weight, bias,
                         compute_dtype=compute_dtype, tile_l=tile_l)
    return jnp.transpose(out, (0, 2, 1))


def _reference_conv_transpose1d(x, w, b, stride=2, padding=1):
    """Brute-force numpy reference matching PyTorch ConvTranspose1d."""
    x = np.asarray(x, np.float32)
    w = np.asarray(w, np.float32)
    b = np.asarray(b, np.float32)
    B, Cin, L = x.shape
    _, Cout, K = w.shape
    Lout = (L - 1) * stride - 2 * padding + K
    out = np.tile(b[None, :, None], (B, 1, Lout)).astype(np.float32)
    for bi in range(B):
        for i in range(L):
            for k in range(K):
                j = i * stride + k - padding
                if 0 <= j < Lout:
                    out[bi, :, j] += x[bi, :, i] @ w[:, :, k]
    return out


if __name__ == "__main__":
    dim = 8      # channels
    B = 2        # batch
    L = 36       # spatial length (not a multiple of 16 -> exercises tail padding)

    key = jax.random.PRNGKey(0)
    kx, kw, kb = jax.random.split(key, 3)
    x = jax.random.normal(kx, (B, dim, L), dtype=jnp.float32)
    weight = jax.random.normal(kw, (dim, dim, 4), dtype=jnp.float32) * 0.1
    bias = jax.random.normal(kb, (dim,), dtype=jnp.float32) * 0.1

    ref = _reference_conv_transpose1d(x, weight, bias)

    # 1) f32 compute path with tiny tiles (TL=8 -> NT=5): exercises the roll +
    #    halo splice and the padded tail; tolerance covers MXU f32 rounding.
    out_f32 = jax.block_until_ready(
        upsample1d(x, weight, bias, compute_dtype=jnp.float32, tile_l=8))
    assert out_f32.shape == (B, dim, 2 * L), out_f32.shape
    np.testing.assert_allclose(np.asarray(out_f32), ref, rtol=1e-2, atol=1e-2)

    # 2) bf16 path with forced tiling (TL=16 -> NT=3): packed-sublane halos.
    out_t = jax.block_until_ready(upsample1d(x, weight, bias, tile_l=16))
    assert out_t.shape == (B, dim, 2 * L), out_t.shape
    np.testing.assert_allclose(np.asarray(out_t), ref, rtol=3e-2, atol=3e-2)

    # 3) default path (one large tile per batch element, grid = (2, 1)).
    out_d = jax.block_until_ready(upsample1d(x, weight, bias))
    assert out_d.shape == (B, dim, 2 * L), out_d.shape
    np.testing.assert_allclose(np.asarray(out_d), ref, rtol=3e-2, atol=3e-2)

    print("KERNEL_OK")
</pallas_src>

<mosaic_0001>
module attributes {stable_mosaic.version = 11 : i64} {
  func.func @_upsample1d_kernel(%arg0: i32, %arg1: i32, %arg2: memref<1x8x8xf32, #tpu.memory_space<vmem>>, %arg3: memref<1x8x8xf32, #tpu.memory_space<vmem>>, %arg4: memref<1x8x8xf32, #tpu.memory_space<vmem>>, %arg5: memref<8x16xf32, #tpu.memory_space<vmem>>, %arg6: memref<8x8xf32, #tpu.memory_space<vmem>>, %arg7: memref<8x8xf32, #tpu.memory_space<vmem>>, %arg8: memref<1x8xf32, #tpu.memory_space<vmem>>, %arg9: memref<1x8x16xf32, #tpu.memory_space<vmem>>) attributes {dimension_semantics = [#tpu.dimension_semantics<parallel>, #tpu.dimension_semantics<parallel>], iteration_bounds = array<i64: 2, 5>, scalar_prefetch = 0 : i64, scratch_operands = 0 : i64, tpu.core_type = #tpu.core_type<tc>, window_params = [{transform_indices = @transform_0, window_bounds = array<i64: 1, 8, 8>}, {transform_indices = @transform_1, window_bounds = array<i64: 1, 8, 8>}, {transform_indices = @transform_2, window_bounds = array<i64: 1, 8, 8>}, {pipeline_mode = #tpu.pipeline_mode<synchronous>, transform_indices = @transform_3, window_bounds = array<i64: 8, 16>}, {pipeline_mode = #tpu.pipeline_mode<synchronous>, transform_indices = @transform_4, window_bounds = array<i64: 8, 8>}, {pipeline_mode = #tpu.pipeline_mode<synchronous>, transform_indices = @transform_5, window_bounds = array<i64: 8, 8>}, {pipeline_mode = #tpu.pipeline_mode<synchronous>, transform_indices = @transform_6, window_bounds = array<i64: 1, 8>}, {transform_indices = @transform_7, window_bounds = array<i64: 1, 8, 16>}]} {
    %c0 = arith.constant 0 : index
    %c0_0 = arith.constant 0 : index
    %c0_1 = arith.constant 0 : index
    %0 = vector.load %arg2[%c0, %c0_0, %c0_1] : memref<1x8x8xf32, #tpu.memory_space<vmem>>, vector<1x8x8xf32>
    %1 = vector.shape_cast %0 : vector<1x8x8xf32> to vector<8x8xf32>
    %c0_2 = arith.constant 0 : index
    %c7 = arith.constant 7 : index
    %c0_3 = arith.constant 0 : index
    %2 = vector.load %arg3[%c0_2, %c7, %c0_3] : memref<1x8x8xf32, #tpu.memory_space<vmem>>, vector<1x1x8xf32>
    %3 = vector.shape_cast %2 : vector<1x1x8xf32> to vector<1x8xf32>
    %c0_4 = arith.constant 0 : index
    %c0_5 = arith.constant 0 : index
    %c0_6 = arith.constant 0 : index
    %4 = vector.load %arg4[%c0_4, %c0_5, %c0_6] : memref<1x8x8xf32, #tpu.memory_space<vmem>>, vector<1x1x8xf32>
    %5 = vector.shape_cast %4 : vector<1x1x8xf32> to vector<1x8xf32>
    %c0_i32 = arith.constant 0 : i32
    %6 = arith.cmpi sgt, %arg1, %c0_i32 : i32
    %cst = arith.constant 0.000000e+00 : f32
    %7 = vector.broadcast %cst : f32 to vector<1x8xf32>
    %8 = arith.select %6, %3, %7 : vector<1x8xf32>
    %c4_i32 = arith.constant 4 : i32
    %9 = arith.cmpi slt, %arg1, %c4_i32 : i32
    %cst_7 = arith.constant 0.000000e+00 : f32
    %10 = vector.broadcast %cst_7 : f32 to vector<1x8xf32>
    %11 = arith.select %9, %5, %10 : vector<1x8xf32>
    %12 = tpu.iota {dimensions = array<i32: 0>} : vector<8x8xi32>
    %c0_i32_8 = arith.constant 0 : i32
    %13 = vector.broadcast %c0_i32_8 : i32 to vector<8x8xi32>
    %14 = arith.cmpi eq, %12, %13 : vector<8x8xi32>
    %c1_i32 = arith.constant 1 : i32
    %15 = tpu.dynamic_rotate %1 by %c1_i32 dim 0 : vector<8x8xf32>, i32 -> vector<8x8xf32>
    %16 = vector.shape_cast %8 : vector<1x8xf32> to vector<1x8xf32>
    %17 = vector.broadcast %16 : vector<1x8xf32> to vector<8x8xf32>
    %18 = arith.select %14, %17, %15 : vector<8x8xi1>, vector<8x8xf32>
    %c7_i32 = arith.constant 7 : i32
    %19 = vector.broadcast %c7_i32 : i32 to vector<8x8xi32>
    %20 = arith.cmpi eq, %12, %19 : vector<8x8xi32>
    %c7_i32_9 = arith.constant 7 : i32
    %21 = tpu.dynamic_rotate %1 by %c7_i32_9 dim 0 : vector<8x8xf32>, i32 -> vector<8x8xf32>
    %22 = vector.shape_cast %11 : vector<1x8xf32> to vector<1x8xf32>
    %23 = vector.broadcast %22 : vector<1x8xf32> to vector<8x8xf32>
    %24 = arith.select %20, %23, %21 : vector<8x8xi1>, vector<8x8xf32>
    %c0_10 = arith.constant 0 : index
    %c0_11 = arith.constant 0 : index
    %25 = vector.load %arg5[%c0_10, %c0_11] : memref<8x16xf32, #tpu.memory_space<vmem>>, vector<8x16xf32>
    %cst_12 = arith.constant dense<0.000000e+00> : vector<8x16xf32>
    %26 = tpu.matmul %1, %25, %cst_12 {dimension_numbers = #tpu.dot_dimension_numbers<[1], [0], [0], [1], [0, 0, 1, 1], [], []>} : vector<8x8xf32>, vector<8x16xf32>, vector<8x16xf32> -> vector<8x16xf32>
    %c0_13 = arith.constant 0 : index
    %c0_14 = arith.constant 0 : index
    %27 = vector.load %arg8[%c0_13, %c0_14] : memref<1x8xf32, #tpu.memory_space<vmem>>, vector<1x8xf32>
    %28 = vector.extract_strided_slice %26 {offsets = [0, 0], sizes = [8, 8], strides = [1, 1]} : vector<8x16xf32> to vector<8x8xf32>
    %c0_15 = arith.constant 0 : index
    %c0_16 = arith.constant 0 : index
    %29 = vector.load %arg6[%c0_15, %c0_16] : memref<8x8xf32, #tpu.memory_space<vmem>>, vector<8x8xf32>
    %cst_17 = arith.constant dense<0.000000e+00> : vector<8x8xf32>
    %30 = tpu.matmul %18, %29, %cst_17 {dimension_numbers = #tpu.dot_dimension_numbers<[1], [0], [0], [1], [0, 0, 1, 1], [], []>} : vector<8x8xf32>, vector<8x8xf32>, vector<8x8xf32> -> vector<8x8xf32>
    %31 = arith.addf %28, %30 : vector<8x8xf32>
    %32 = vector.broadcast %27 : vector<1x8xf32> to vector<8x8xf32>
    %33 = arith.addf %31, %32 : vector<8x8xf32>
    %34 = vector.extract_strided_slice %26 {offsets = [0, 8], sizes = [8, 8], strides = [1, 1]} : vector<8x16xf32> to vector<8x8xf32>
    %c0_18 = arith.constant 0 : index
    %c0_19 = arith.constant 0 : index
    %35 = vector.load %arg7[%c0_18, %c0_19] : memref<8x8xf32, #tpu.memory_space<vmem>>, vector<8x8xf32>
    %cst_20 = arith.constant dense<0.000000e+00> : vector<8x8xf32>
    %36 = tpu.matmul %24, %35, %cst_20 {dimension_numbers = #tpu.dot_dimension_numbers<[1], [0], [0], [1], [0, 0, 1, 1], [], []>} : vector<8x8xf32>, vector<8x8xf32>, vector<8x8xf32> -> vector<8x8xf32>
    %37 = arith.addf %34, %36 : vector<8x8xf32>
    %38 = vector.broadcast %27 : vector<1x8xf32> to vector<8x8xf32>
    %39 = arith.addf %37, %38 : vector<8x8xf32>
    %c0_21 = arith.constant 0 : index
    %c0_22 = arith.constant 0 : index
    %c0_23 = arith.constant 0 : index
    %40 = vector.load %arg9[%c0_21, %c0_22, %c0_23] : memref<1x8x16xf32, #tpu.memory_space<vmem>>, vector<1x8x8xf32>
    %41 = vector.shape_cast %40 : vector<1x8x8xf32> to vector<8x8xf32>
    %42 = vector.shape_cast %33 : vector<8x8xf32> to vector<1x8x8xf32>
    tpu.vector_store %arg9[%c0_21, %c0_22, %c0_23], %42 {strides = array<i32>} : memref<1x8x16xf32, #tpu.memory_space<vmem>>, vector<1x8x8xf32>,
    %c0_24 = arith.constant 0 : index
    %c0_25 = arith.constant 0 : index
    %c8 = arith.constant 8 : index
    %43 = vector.load %arg9[%c0_24, %c0_25, %c8] : memref<1x8x16xf32, #tpu.memory_space<vmem>>, vector<1x8x8xf32>
    %44 = vector.shape_cast %43 : vector<1x8x8xf32> to vector<8x8xf32>
    %45 = vector.shape_cast %39 : vector<8x8xf32> to vector<1x8x8xf32>
    tpu.vector_store %arg9[%c0_24, %c0_25, %c8], %45 {strides = array<i32>} : memref<1x8x16xf32, #tpu.memory_space<vmem>>, vector<1x8x8xf32>,
    return
  }
  func.func @transform_0(%arg0: i32, %arg1: i32) -> (i32, i32, i32) {
    %c0_i32 = arith.constant 0 : i32
    %c0_i32_0 = arith.constant 0 : i32
    return %arg0, %arg1, %c0_i32 : i32, i32, i32
  }
  func.func @transform_1(%arg0: i32, %arg1: i32) -> (i32, i32, i32) {
    %c1_i32 = arith.constant 1 : i32
    %0 = arith.muli %arg1, %c1_i32 : i32
    %c1_i32_0 = arith.constant 1 : i32
    %1 = arith.subi %0, %c1_i32_0 : i32
    %c0_i32 = arith.constant 0 : i32
    %2 = arith.maxsi %1, %c0_i32 : i32
    %c0_i32_1 = arith.constant 0 : i32
    %c0_i32_2 = arith.constant 0 : i32
    return %arg0, %2, %c0_i32_1 : i32, i32, i32
  }
  func.func @transform_2(%arg0: i32, %arg1: i32) -> (i32, i32, i32) {
    %c1_i32 = arith.constant 1 : i32
    %0 = arith.addi %arg1, %c1_i32 : i32
    %c1_i32_0 = arith.constant 1 : i32
    %1 = arith.muli %0, %c1_i32_0 : i32
    %c4_i32 = arith.constant 4 : i32
    %2 = arith.minsi %1, %c4_i32 : i32
    %c0_i32 = arith.constant 0 : i32
    %c0_i32_1 = arith.constant 0 : i32
    return %arg0, %2, %c0_i32 : i32, i32, i32
  }
  func.func @transform_3(%arg0: i32, %arg1: i32) -> (i32, i32) {
    %c0_i32 = arith.constant 0 : i32
    %c0_i32_0 = arith.constant 0 : i32
    %c0_i32_1 = arith.constant 0 : i32
    return %c0_i32, %c0_i32_0 : i32, i32
  }
  func.func @transform_4(%arg0: i32, %arg1: i32) -> (i32, i32) {
    %c0_i32 = arith.constant 0 : i32
    %c0_i32_0 = arith.constant 0 : i32
    %c0_i32_1 = arith.constant 0 : i32
    return %c0_i32, %c0_i32_0 : i32, i32
  }
  func.func @transform_5(%arg0: i32, %arg1: i32) -> (i32, i32) {
    %c0_i32 = arith.constant 0 : i32
    %c0_i32_0 = arith.constant 0 : i32
    %c0_i32_1 = arith.constant 0 : i32
    return %c0_i32, %c0_i32_0 : i32, i32
  }
  func.func @transform_6(%arg0: i32, %arg1: i32) -> (i32, i32) {
    %c0_i32 = arith.constant 0 : i32
    %c0_i32_0 = arith.constant 0 : i32
    %c0_i32_1 = arith.constant 0 : i32
    return %c0_i32, %c0_i32_0 : i32, i32
  }
  func.func @transform_7(%arg0: i32, %arg1: i32) -> (i32, i32, i32) {
    %c0_i32 = arith.constant 0 : i32
    %c0_i32_0 = arith.constant 0 : i32
    return %arg0, %arg1, %c0_i32 : i32, i32, i32
  }
}

</mosaic_0001>

<bundles_post_ra>
// kernel: tpu_custom_call.1
= control target key start
LH: loop header
LB: loop body
LE: loop exit
PB: predicated region body
PF: predicated region fallthrough
CT: control target
= control target key end

     0   :  { %s985_s24 = smov 0   ;;  %s987_s25 = smov 0   ;;  %s1092_s0 = inlined_call_operand.vmem [shape: f32[2,40,8], index: 0, kind: input, shape index: {}]   ;;  %s1093_s1 = inlined_call_operand.vmem [shape: f32[2,40,8], index: 1, kind: input, shape index: {}]   ;;  %s1094_s2 = inlined_call_operand.vmem [shape: f32[2,40,8], index: 2, kind: input, shape index: {}]   ;;  %s1095_s3 = inlined_call_operand.vmem [shape: f32[8,16], index: 3, kind: input, shape index: {}]   ;;  %s1096_s4 = inlined_call_operand.vmem [shape: f32[8,8], index: 4, kind: input, shape index: {}]   ;;  %s1097_s5 = inlined_call_operand.vmem [shape: f32[8,8], index: 5, kind: input, shape index: {}]   ;;  %s1098_s6 = inlined_call_operand.vmem [shape: f32[1,8], index: 6, kind: input, shape index: {}]   ;;  %s1099_s7 = inlined_call_operand.vmem [shape: f32[2,40,16], index: 7, kind: output, shape index: {}]  }
   0x1   :  { %s989_s26 = smov 0   ;;  %s991_s27 = smov 0  }
   0x2   :  { %s993_s28 = smov 0  }
   0x3 LB: > { %s26_s29 = sadd.s32 1, %s932_s26  ;;  %s29_s30 = sadd.s32 1, %s936_s27  ;;  %s940_s28 = sphi %s993_s28, %s17_s28   ;;  %s936_s27 = sphi %s991_s27, %s1104_s27   ;;  %s932_s26 = sphi %s989_s26, %s1103_s26   ;;  %s928_s25 = sphi %s987_s25, %s1102_s25   ;;  %s924_s24 = sphi %s985_s24, %s1101_s24  }
   0x4   : > { %p27_p0 = scmp.ge.s32.totalorder %s26_s29, 5  ;;  %p815_p1 = scmp.ge.s32.totalorder %s940_s28, 1 }
   0x5   : > { %p310_p2 = scmp.lt.s32.totalorder %s940_s28, 11 }
   0x6   : > { %s1106_s29 = smov (%p27_p0, %s26_s29), 0  ;;  %s1108_s30 = smov (!%p27_p0, %s29_s30), %s936_s27 }
   0x7   : > { %p311_p3 = pnand %p815_p1, %p310_p2  ;;  %p31_p4 = scmp.ge.s32.totalorder %s1108_s30, 2 }
   0x8   : > { %v443_v0 = vld [vmem:[%s1095_s3] sm:$0xff] (!%p311_p3)  ;;  %p370_p5 = scmp.lt.s32.totalorder (!%p311_p3), %s928_s25, 1  ;;  %p372_p6 = scmp.lt.s32.totalorder (!%p311_p3), %s924_s24, 4  ;;  %v942_v1 = vmov (!%p311_p3), 0.0   ;;  %vm943_vm0 = vmmov (!%p311_p3), 0   ;;  %v427_v3 = vlaneseq (!%p311_p3)  ;;  %vm444_vm1 = vcmask (!%p311_p3), 64512  }
   0x9   : > { %s1110_s30 = smov (%p31_p4, %s1108_s30), 0  ;;  %314 = sbr.rel (%p311_p3) target bundleno = 368 (0x170), region = 48 }
   0xa   : > { %843 = vmatprep.subr.mxu0 (!%p311_p3), %v942_v1  ;;  %845 = vmatprep.mubr.msk.f32.mxu0 (!%p311_p3), %vm943_vm0, %v942_v1  ;;  %v519_v2 = vld [vmem:[%s1096_s4] sm:$0xff] (!%p311_p3)  ;;  %s817_s12 = sadd.s32 (!%p311_p3), 4294967295, %s924_s24  ;;  %p417_p8 = scmp.gt.s32.totalorder (!%p311_p3), %s924_s24, 0  ;;  %v428_v6 = vshrl.u32 (!%p311_p3), %v427_v3, 7  ;;  %vm685_vm6 = vcmask (!%p311_p3), 130112  }
   0xb   : > { %844 = vmatpush3.msra.mxu0 (!%p311_p3), %v443_v0  ;;  %848 = vmatprep.subr.mxu1 (!%p311_p3), %v942_v1  ;;  %p379_p7 = scmp.gt.s32.totalorder (!%p311_p3), %s817_s12, 0  ;;  %p818_p9 = scmp.lt.s32.totalorder (!%p311_p3), %s817_s12, 4  ;;  %v601_v4 = vld [vmem:[%s1097_s5] sm:$0xff] (!%p311_p3) }
   0xc   : > { %853 = vmatprep.subr.mxu0 (!%p311_p3), %v942_v1  ;;  %849 = vmatpush3.msra.mxu1 (!%p311_p3), %v519_v2  ;;  %s392_s23 = sadd.s32 (!%p311_p3), 1, %s924_s24  ;;  %v433_v8 = vsub.s32 (!%p311_p3), 0, %v428_v6  ;;  %vm429_vm3 = vcmp.eq.s32.totalorder (!%p311_p3), %v428_v6, 0  ;;  %vm436_vm5 = vcmp.eq.s32.totalorder (!%p311_p3), %v428_v6, 7  ;;  %v831_v23 = vld [vmem:[%s1098_s6] ss:$0 sm:$0xff] (!%p311_p3) }
   0xd   : > { %850 = vmatprep.mubr.msk.f32.mxu1 (!%p311_p3), %vm943_vm0, %v942_v1  ;;  %p1050_p10 = scmp.lt.s32.totalorder (!%p311_p3), %s392_s23, 4 }
  0x10   : > { %s1112_s25 = smov (!%p370_p5, %s928_s25), 1  ;;  %s1114_s12 = smov (!%p379_p7, %s817_s12), 0 }
  0x11   : > { %s373_s13 = scalar_select %p372_p6, %s924_s24, 4 }
  0x12   : > { %s1029_s14 = smul.u32 5, %s1112_s25  ;;  %s1116_s12 = smov (!%p818_p9, %s1114_s12), 4 }
  0x13   : > { %s1034_s15 = scalar_select %p372_p6, 1, 0 }
  0x14   : > { %s375_s16 = sadd.s32 %s1029_s14, %s373_s13  ;;  %s386_s24 = sadd.s32 %s1029_s14, %s1116_s12 }
  0x15   : > { %s1038_s17 = sshll.u32 %s375_s16, 3  ;;  %s823_s9 = sshll.u32 %s386_s24, 3  ;;  %v424_v12 = vstv %s1034_s15 }
  0x16   : > { %s377_s20 = scalar_lea.vmem %s1092_s0, %s1038_s17  ;;  %s388_s13 = scalar_lea.vmem %s1093_s1, %s823_s9  ;;  %vm425_vm4 = vcmp.eq.s32.totalorder %v424_v12, 1 }
  0x17   : > { %v414_v5 = vld [vmem:[%s377_s20] sm:$0xff]  ;;  %s418_s25 = scalar_select %p417_p8, 1, 0 }
  0x18   : > { %846 = vmatmul.mubr.msk.f32.vlgmr.msra.gmra.mrb[0].mxu0 %vm444_vm1, %v414_v5  ;;  %v430_v9 = vrot.slane %v414_v5, 7  ;;  %v415_v10 = vld [vmem:[%s388_s13 + $0x7] sm:$0x1]  ;;  %s1118_s23 = smov (!%p1050_p10, %s392_s23), 4  ;;  %v437_v15 = vrot.slane %v414_v5, 1 }
  0x19   : > { %854 = vmatpush3.msra.mxu0 %v601_v4  ;;  %855 = vmatprep.mubr.msk.f32.mxu0 %vm943_vm0, %v942_v1  ;;  %v419_v7 = vstv %s418_s25  ;;  %s1120_s23 = smov (!%p1050_p10, %s1118_s23), 4  ;;  %s944_s25 = smov 8  }
  0x1a   : > { %vm420_vm2 = vcmp.eq.s32.totalorder %v419_v7, 1  ;;  %s400_s16 = sadd.s32 %s1029_s14, %s1120_s23  ;;  %s413_s23 = scalar_lea.vmem %s1099_s7, %s1038_s17 }
  0x1b   : > { %v421_v11 = vsel %vm420_vm2, %v415_v10, 0.0  ;;  %s827_s12 = sshll.u32 %s400_s16, 3 }
  0x1c   : > { %v434_v13 = vrot.slane %v421_v11, %v433_v8  ;;  %s402_s20 = scalar_lea.vmem %s1094_s2, %s827_s12 }
  0x1d   : > { %v416_v16 = vld [vmem:[%s402_s20] sm:$0x1] }
  0x1e   : > { %v435_v14 = vsel %vm429_vm3, %v434_v13, %v430_v9  ;;  %v426_v17 = vsel %vm425_vm4, %v416_v16, 0.0 }
  0x1f   : > { %851 = vmatmul.mubr.msk.f32.vlgmr.msra.gmra.mrb[0].mxu1 %vm444_vm1, %v435_v14  ;;  %v441_v18 = vrot.slane %v426_v17, %v433_v8 }
  0x21   : > { %v442_v19 = vsel %vm436_vm5, %v441_v18, %v437_v15 }
  0x22   : > { %856 = vmatmul.mubr.msk.f32.vlgmr.msra.gmra.mrb[2].mxu0 %vm444_vm1, %v442_v19 }
  0xeb   : > { %v514_v20 = vpop.f32.mrb[0].mxu0 }
  0xec   : > { %v847_v21 = vpop.f32.mrb[1].mxu0 }
  0xf2   : > { %v589_v22 = vpop.f32.mrb[0].mxu1 }
  0xf3   : > { %v593_v24 = vadd.f32 %v589_v22, %v514_v20  ;;  %v852_v25 = vpop.f32.mrb[1].mxu1 }
  0xf5   : > { %v600_v26 = vadd.f32 %v831_v23, %v593_v24  ;;  %v671_v27 = vpop.f32.mrb[2].mxu0 }
  0xf6   : > { %676 = vrot.lane.b32.xlu0 %v671_v27, %s944_s25  ;;  %v857_v28 = vpop.f32.mrb[3].mxu0 }
  0xf7   : > { %684 = vst.msk [vmem:[%s413_s23] sm:$0xff] %vm444_vm1, %v600_v26 }
  0xfa   : > { %680 = vrot.lane.b32.xlu0 %v831_v23, %s944_s25 }
 0x168   : > { %v677_v29 = vpop.permute.xlu0 %676 }
 0x169   : > { %v679_v30 = vadd.f32 %v677_v29, %v514_v20 }
 0x16c   : > { %v681_v31 = vpop.permute.xlu0 %680 }
 0x16d   : > { %v683_v32 = vadd.f32 %v681_v31, %v679_v30 }
 0x16f   : > { %686 = vst.msk [vmem:[%s413_s23] sm:$0xff] %vm685_vm6, %v683_v32 }
 0x170 PF: > { %s17_s28 = sadd.s32 1, %s940_s28   ;;  %s1101_s24 = smov %s932_s26 }
 0x171   : > { %p14_p11 = scmp.ge.s32.totalorder %s17_s28, 12   ;;  %s1102_s25 = smov %s936_s27 }
 0x172   : > { %s1103_s26 = smov %s1106_s29  ;;  %s1104_s27 = smov %s1110_s30 }
 0x173   :  { %16 = sbr.rel (!%p14_p11) target bundleno = 3 (0x3), region = 84 }

</bundles_post_ra>
